<compile_context>
chip_gen: v7x
topology: tpu7x:2x2x1
jax: 0.10.0
libtpu: 0.0.40
codegen_flags: <defaults>
</compile_context>

<pallas_src>
import math

import jax
import jax.numpy as jnp
from jax import lax
from jax.experimental import pallas as pl
from jax.experimental.pallas import tpu as pltpu


# ----------------------------- glue helpers --------------------------------

def hsigmoid(t):
    # F.relu6(x + 3.0) / 3.0
    return jnp.clip(t + 3.0, 0.0, 6.0) / 3.0


def se_module_small(y, w_se):
    """SEModule_small: x * Hsigmoid(Linear(x))   (bias-free linear)."""
    return y * hsigmoid(y @ w_se.T)


def im2col(x, k, stride, pad):
    """x: (B, C, H, W) -> (B, C*k*k, Ho*Wo) with (c, kh, kw) row ordering."""
    B, C, H, W = x.shape
    xp = jnp.pad(x, ((0, 0), (0, 0), (pad, pad), (pad, pad)))
    Ho = (H + 2 * pad - k) // stride + 1
    Wo = (W + 2 * pad - k) // stride + 1
    cols = []
    for kh in range(k):
        for kw in range(k):
            cols.append(
                xp[:, :, kh:kh + (Ho - 1) * stride + 1:stride,
                         kw:kw + (Wo - 1) * stride + 1:stride])
    p = jnp.stack(cols, axis=2)                    # (B, C, k*k, Ho, Wo)
    return p.reshape(B, C * k * k, Ho * Wo), Ho, Wo


def fold_bn(gamma, beta, running_mean, running_var, eps=1e-5):
    s = gamma / jnp.sqrt(running_var + eps)
    b = beta - running_mean * s
    return jnp.stack([s, b], axis=1).astype(jnp.float32)   # (dim, 2)


def _round_up(a, m):
    return ((a + m - 1) // m) * m


# ----------------------------- Pallas kernel --------------------------------

def _conv_dy_kernel(x_ref, w_ref, bias_ref, out_ref):
    """out[b, :, tile] = W_all[b] @ X_all[b, :, tile] + bias[b].

    x_ref   : (1, Kp, NT)      bf16 activations (patches ; xq), zero-padded
    w_ref   : (1, planes, Kp)  bf16 per-sample weight [scale*w_conv | W_eff]
    bias_ref: (1, planes, 1)   f32 per-sample bias
    out_ref : (1, planes, NT)
    One bf16 MXU dot with f32 accumulation + a broadcast bias add on the VPU.
    """
    acc = jnp.dot(w_ref[0], x_ref[0], preferred_element_type=jnp.float32)
    out_ref[0] = (acc + bias_ref[0]).astype(out_ref.dtype)


# ------------------------------- forward ------------------------------------

def conv_dy_forward(x, params, *, kernel_size, stride, padding,
                    nt=512, out_dtype=jnp.float32):
    B, C, H, W = x.shape
    planes = params["w_conv4d"].shape[0]
    dim = int(round(math.sqrt(C)))
    assert dim * dim == C, "conv_dy requires inplanes to be a perfect square"
    k = kernel_size
    f32 = jnp.float32
    bf16 = jnp.bfloat16

    # ---- squeeze-excite glue (tiny; global pool + MLP stay in XLA) ----
    pooled = x.mean(axis=(2, 3))                               # (B, C)
    y1 = pooled @ params["w_fc1"].T                            # (B, squeeze)
    y = se_module_small(y1, params["w_se"])                    # SEModule_small
    phi = (y @ params["w_phi"].T).reshape(B, dim, dim)         # (B, dim, dim)
    scale = hsigmoid(y @ params["w_scale"].T)                  # (B, planes)

    # ---- fold q -> bn1 -> phi -> bn2 -> p into per-sample W_eff / bias_eff ----
    s1, b1v = params["bn1f"][:, 0], params["bn1f"][:, 1]
    s2, b2v = params["bn2f"][:, 0], params["bn2f"][:, 1]
    M = s2[None, :, None] * phi + jnp.eye(dim, dtype=f32)[None]           # (B,d,d)
    A = s1[:, None] * params["w_q"]                                        # (d, C)
    W_eff = jnp.einsum("pd,bde,ec->bpc", params["w_p"], M, A)              # (B,planes,C)
    bias_eff = jnp.einsum("pd,bd->bp", params["w_p"],
                          jnp.einsum("bde,e->bd", M, b1v) + b2v[None, :])  # (B,planes)

    # ---- fold the SE scale into the static conv weight; ONE weight per sample ----
    CK = C * k * k
    w_conv2d = params["w_conv4d"].reshape(planes, CK)
    W_conv_eff = scale[:, :, None] * w_conv2d[None]                        # (B,planes,CK)
    W_all = jnp.concatenate([W_conv_eff, W_eff], axis=2)                   # (B,planes,CK+C)

    # ---- activations: [patches ; xq] stacked along the contraction axis ----
    patches, Ho, Wo = im2col(x, k, stride, padding)                        # (B, CK, L)
    L = Ho * Wo
    xq = x[:, :, ::stride, ::stride].reshape(B, C, -1)                     # (B, C, Lq)
    if xq.shape[2] != L:
        raise ValueError("q-path spatial size must match conv output size "
                         "(as in the PyTorch module)")
    X_all = jnp.concatenate([patches, xq], axis=1)                         # (B, K, L)

    # ---- pad contraction to a 128-multiple, lanes to a multiple of NT ----
    K = CK + C
    Kp = _round_up(K, 128)
    NT = min(nt, _round_up(L, 128))
    Lp = _round_up(L, NT)
    n_l = Lp // NT
    X_all = jnp.pad(X_all, ((0, 0), (0, Kp - K), (0, Lp - L)))
    W_all = jnp.pad(W_all, ((0, 0), (0, 0), (0, Kp - K)))
    bias3 = bias_eff[:, :, None].astype(f32)                               # (B,planes,1)

    # ---- explicit VMEM budget (double-buffered blocks) & cost estimate ----
    blk_bytes = (Kp * NT * 2           # activation tile (bf16)
                 + planes * Kp * 2     # weight tile     (bf16)
                 + planes * 128 * 4    # bias tile padded to a lane
                 + planes * NT * 4)    # output tile (f32)
    vmem_limit = int(min(64 << 20, max(4 * blk_bytes, 16 << 20)))
    out_itemsize = jnp.dtype(out_dtype).itemsize
    cost = pl.CostEstimate(
        flops=2 * B * planes * Kp * Lp,
        transcendentals=0,
        bytes_accessed=int(B * Kp * Lp * 2 + B * planes * Kp * 2
                           + B * planes * 4 + B * planes * Lp * out_itemsize))

    out_padded = pl.pallas_call(
        _conv_dy_kernel,
        out_shape=jax.ShapeDtypeStruct((B, planes, Lp), out_dtype),
        grid_spec=pltpu.PrefetchScalarGridSpec(
            num_scalar_prefetch=0,
            grid=(B, n_l),
            in_specs=[
                pl.BlockSpec((1, Kp, NT), lambda b, l: (b, 0, l)),       # activations
                pl.BlockSpec((1, planes, Kp), lambda b, l: (b, 0, 0)),   # per-sample W
                pl.BlockSpec((1, planes, 1), lambda b, l: (b, 0, 0)),    # per-sample bias
            ],
            out_specs=pl.BlockSpec((1, planes, NT), lambda b, l: (b, 0, l)),
        ),
        compiler_params=pltpu.CompilerParams(
            dimension_semantics=("parallel", "parallel"),
            vmem_limit_bytes=vmem_limit),
        cost_estimate=cost,
    )(X_all.astype(bf16), W_all.astype(bf16), bias3)

    out = out_padded[:, :, :L].astype(f32)
    return out.reshape(B, planes, Ho, Wo)


# ------------------------- pure-JAX reference --------------------------------

def conv_dy_reference(x, params, *, kernel_size, stride, padding):
    B, C, H, W = x.shape
    dim = int(round(math.sqrt(C)))

    r = lax.conv_general_dilated(
        x, params["w_conv4d"], (stride, stride),
        ((padding, padding), (padding, padding)),
        dimension_numbers=("NCHW", "OIHW", "NCHW"))

    pooled = x.mean(axis=(2, 3))
    y1 = pooled @ params["w_fc1"].T
    y = y1 * hsigmoid(y1 @ params["w_se"].T)                 # SEModule_small
    phi = (y @ params["w_phi"].T).reshape(B, dim, dim)
    scale = hsigmoid(y @ params["w_scale"].T)[:, :, None, None]
    r = scale * r

    xq = x[:, :, ::stride, ::stride]
    q = jnp.einsum("dc,bchw->bdhw", params["w_q"], xq)
    s1, b1 = params["bn1f"][:, 0], params["bn1f"][:, 1]
    s2, b2 = params["bn2f"][:, 0], params["bn2f"][:, 1]
    o = q * s1[None, :, None, None] + b1[None, :, None, None]
    Hq, Wq = o.shape[2], o.shape[3]
    o = o.reshape(B, dim, Hq * Wq)
    m = jnp.einsum("bij,bjl->bil", phi, o)
    o = m * s2[None, :, None] + b2[None, :, None] + o
    o = o.reshape(B, dim, Hq, Wq)
    out = jnp.einsum("od,bdhw->bohw", params["w_p"], o) + r
    return out


# --------------------------------- main --------------------------------------

if __name__ == "__main__":
    # conv_dy(inplanes=64, planes=32, kernel_size=3, stride=1, padding=1)
    B, C, H, W = 2, 64, 8, 8
    planes, kernel_size, stride, padding = 32, 3, 1, 1
    dim = int(round(math.sqrt(C)))                 # 8
    squeeze = max(C, dim * dim) // 16              # 4

    key = jax.random.PRNGKey(0)
    ks = jax.random.split(key, 12)
    f32 = jnp.float32
    params = {
        "w_conv4d": 0.1 * jax.random.normal(ks[0], (planes, C, kernel_size, kernel_size), f32),
        "w_q":      0.1 * jax.random.normal(ks[1], (dim, C), f32),
        "w_p":      0.1 * jax.random.normal(ks[2], (planes, dim), f32),
        "w_fc1":    0.1 * jax.random.normal(ks[3], (squeeze, C), f32),
        "w_se":     0.1 * jax.random.normal(ks[4], (squeeze, squeeze), f32),
        "w_phi":    0.1 * jax.random.normal(ks[5], (dim * dim, squeeze), f32),
        "w_scale":  0.1 * jax.random.normal(ks[6], (planes, squeeze), f32),
    }
    # BatchNorm params (eval mode, running stats at PyTorch init values)
    g1 = 1.0 + 0.1 * jax.random.normal(ks[7], (dim,), f32)
    b1 = 0.1 * jax.random.normal(ks[8], (dim,), f32)
    g2 = 1.0 + 0.1 * jax.random.normal(ks[9], (dim,), f32)
    b2 = 0.1 * jax.random.normal(ks[10], (dim,), f32)
    zeros, ones = jnp.zeros((dim,), f32), jnp.ones((dim,), f32)
    params["bn1f"] = fold_bn(g1, b1, zeros, ones)
    params["bn2f"] = fold_bn(g2, b2, zeros, ones)

    x = jax.random.normal(ks[11], (B, C, H, W), f32)

    out = conv_dy_forward(x, params, kernel_size=kernel_size,
                          stride=stride, padding=padding)
    out = jax.block_until_ready(out)

    ref = conv_dy_reference(x, params, kernel_size=kernel_size,
                            stride=stride, padding=padding)
    assert out.shape == ref.shape == (B, planes, H, W)
    max_err = float(jnp.max(jnp.abs(out - ref)))
    # bf16 MXU operands with f32 accumulation -> looser tolerance than pure f32
    assert max_err < 5e-2, f"mismatch vs reference: {max_err}"

    print("KERNEL_OK")
</pallas_src>

<mosaic_0001>
module attributes {stable_mosaic.version = 11 : i64} {
  func.func @_conv_dy_kernel(%arg0: i32, %arg1: i32, %arg2: memref<1x640x128xbf16, #tpu.memory_space<vmem>>, %arg3: memref<1x32x640xbf16, #tpu.memory_space<vmem>>, %arg4: memref<1x32x1xf32, #tpu.memory_space<vmem>>, %arg5: memref<1x32x128xf32, #tpu.memory_space<vmem>>) attributes {dimension_semantics = [#tpu.dimension_semantics<parallel>, #tpu.dimension_semantics<parallel>], iteration_bounds = array<i64: 2, 1>, scalar_prefetch = 0 : i64, scratch_operands = 0 : i64, tpu.core_type = #tpu.core_type<tc>, window_params = [{transform_indices = @transform_0, window_bounds = array<i64: 1, 640, 128>}, {transform_indices = @transform_1, window_bounds = array<i64: 1, 32, 640>}, {transform_indices = @transform_2, window_bounds = array<i64: 1, 32, 1>}, {transform_indices = @transform_3, window_bounds = array<i64: 1, 32, 128>}]} {
    %c0 = arith.constant 0 : index
    %c0_0 = arith.constant 0 : index
    %c0_1 = arith.constant 0 : index
    %0 = vector.load %arg3[%c0, %c0_0, %c0_1] : memref<1x32x640xbf16, #tpu.memory_space<vmem>>, vector<1x32x640xbf16>
    %1 = vector.shape_cast %0 : vector<1x32x640xbf16> to vector<32x640xbf16>
    %c0_2 = arith.constant 0 : index
    %c0_3 = arith.constant 0 : index
    %c0_4 = arith.constant 0 : index
    %2 = vector.load %arg2[%c0_2, %c0_3, %c0_4] : memref<1x640x128xbf16, #tpu.memory_space<vmem>>, vector<1x640x128xbf16>
    %3 = vector.shape_cast %2 : vector<1x640x128xbf16> to vector<640x128xbf16>
    %cst = arith.constant dense<0.000000e+00> : vector<32x128xf32>
    %4 = tpu.matmul %1, %3, %cst {dimension_numbers = #tpu.dot_dimension_numbers<[1], [0], [0], [1], [0, 0, 1, 1], [], []>} : vector<32x640xbf16>, vector<640x128xbf16>, vector<32x128xf32> -> vector<32x128xf32>
    %c0_5 = arith.constant 0 : index
    %c0_6 = arith.constant 0 : index
    %c0_7 = arith.constant 0 : index
    %5 = vector.load %arg4[%c0_5, %c0_6, %c0_7] : memref<1x32x1xf32, #tpu.memory_space<vmem>>, vector<1x32x1xf32>
    %6 = vector.shape_cast %5 : vector<1x32x1xf32> to vector<32x1xf32>
    %7 = vector.broadcast %6 : vector<32x1xf32> to vector<32x128xf32>
    %8 = arith.addf %4, %7 : vector<32x128xf32>
    %c0_8 = arith.constant 0 : index
    %c0_9 = arith.constant 0 : index
    %c0_10 = arith.constant 0 : index
    %9 = vector.load %arg5[%c0_8, %c0_9, %c0_10] : memref<1x32x128xf32, #tpu.memory_space<vmem>>, vector<1x32x128xf32>
    %10 = vector.shape_cast %9 : vector<1x32x128xf32> to vector<32x128xf32>
    %11 = vector.shape_cast %8 : vector<32x128xf32> to vector<1x32x128xf32>
    tpu.vector_store %arg5[%c0_8, %c0_9, %c0_10], %11 {strides = array<i32>} : memref<1x32x128xf32, #tpu.memory_space<vmem>>, vector<1x32x128xf32>,
    return
  }
  func.func @transform_0(%arg0: i32, %arg1: i32) -> (i32, i32, i32) {
    %c0_i32 = arith.constant 0 : i32
    %c0_i32_0 = arith.constant 0 : i32
    return %arg0, %c0_i32, %arg1 : i32, i32, i32
  }
  func.func @transform_1(%arg0: i32, %arg1: i32) -> (i32, i32, i32) {
    %c0_i32 = arith.constant 0 : i32
    %c0_i32_0 = arith.constant 0 : i32
    %c0_i32_1 = arith.constant 0 : i32
    return %arg0, %c0_i32, %c0_i32_0 : i32, i32, i32
  }
  func.func @transform_2(%arg0: i32, %arg1: i32) -> (i32, i32, i32) {
    %c0_i32 = arith.constant 0 : i32
    %c0_i32_0 = arith.constant 0 : i32
    %c0_i32_1 = arith.constant 0 : i32
    return %arg0, %c0_i32, %c0_i32_0 : i32, i32, i32
  }
  func.func @transform_3(%arg0: i32, %arg1: i32) -> (i32, i32, i32) {
    %c0_i32 = arith.constant 0 : i32
    %c0_i32_0 = arith.constant 0 : i32
    return %arg0, %c0_i32, %arg1 : i32, i32, i32
  }
}

</mosaic_0001>

<bundles_post_ra>
// kernel: tpu_custom_call.1
= control target key start
LH: loop header
LB: loop body
LE: loop exit
PB: predicated region body
PF: predicated region fallthrough
CT: control target
= control target key end

     0   :  { %8 = vsyncpa [#allocation3], 0  ;;  %s1713_s0 = inlined_call_operand.hbm [shape: bf16[2,640,128], index: 0, kind: input, shape index: {}]   ;;  %s1714_s1 = inlined_call_operand.hbm [shape: bf16[2,32,640], index: 1, kind: input, shape index: {}]   ;;  %s1715_s2 = inlined_call_operand.vmem [shape: f32[2,32,1], index: 2, kind: input, shape index: {}]   ;;  %s1716_s3 = inlined_call_operand.hbm [shape: f32[2,32,128], index: 3, kind: output, shape index: {}]  }
   0x1   :  { %10 = vsyncpa [#allocation3 + $0x1], 0 }
   0x2   :  { %11 = vsyncpa [#allocation6], 0 }
   0x3   :  { %13 = vsyncpa [#allocation6 + $0x1], 0 }
   0x4   :  { %14 = vsyncpa [#allocation4], 0 }
   0x5   :  { %16 = vsyncpa [#allocation4 + $0x1], 0  ;;  %s1428_s12 = smov 0   ;;  %s1430_s13 = smov 0  }
   0x6   :  { %s1432_s14 = smov 0   ;;  %s1434_s15 = smov 0  }
   0x7   :  { %s1436_s16 = smov 0   ;;  %s1438_s17 = smov 0  }
   0x8 LB: > { %s961_s18 = sadd.s32 4294967295, %s1396_s17   ;;  %s962_s19 = sadd.s32 4294967294, %s1396_s17   ;;  %s1396_s17 = sphi %s1438_s17, %s22_s17   ;;  %s1392_s16 = sphi %s1436_s16, %s1734_s16   ;;  %s1388_s15 = sphi %s1434_s15, %s1733_s15   ;;  %s1384_s14 = sphi %s1432_s14, %s1732_s14   ;;  %s1380_s13 = sphi %s1430_s13, %s1731_s13   ;;  %s1376_s12 = sphi %s1428_s12, %s1730_s12  }
   0x9   : > { %s34_s20 = sadd.s32 1, %s1392_s16  ;;  %s43_s21 = sadd.s32 1, %s1384_s14 }
   0xa   : > { %p36_p0 = scmp.ge.s32.totalorder %s34_s20, 2  ;;  %p50_p1 = scmp.ne.s32.totalorder %s1384_s14, %s1380_s13 }
   0xb   : > { %p51_p2 = scmp.eq.s32.totalorder %s1396_s17, 0  ;;  %p56_p3 = scmp.ne.s32.totalorder %s1380_s13, %s1376_s12 }
   0xc   : > { %s1736_s20 = smov (%p36_p0, %s34_s20), 0  ;;  %p57_p5 = scmp.eq.s32.totalorder %s961_s18, 0 }
   0xd   : > { %p1469_p4 = por %p51_p2, %p50_p1  ;;  %s38_s23 = ssub.s32 %s1392_s16, %s1736_s20 }
   0xe   : > { %p134_p6 = scmp.eq.s32.totalorder %s961_s18, 1  ;;  %p41_p7 = scmp.eq.s32.totalorder %s38_s23, 0 }
   0xf   : > { %p1475_p8 = por %p57_p5, %p56_p3  ;;  %p140_p10 = scmp.eq.s32.totalorder %s962_s19, 1 }
  0x10   : > { %p1479_p9 = por %p134_p6, %p50_p1  ;;  %p1137_p13 = scmp.lt.s32.totalorder %s1396_s17, 2 }
  0x11   : > { %s1720_s24 = scalar_select %p1475_p8, 1, 0 }
  0x12   : > { %s1721_s25 = scalar_select %p1479_p9, 1, 0 }
  0x13   : > { %s1484_s26 = scalar_select %p41_p7, %s1384_s14, %s43_s21  }
  0x14   : > { %p1486_p11 = por %p140_p10, %p56_p3  ;;  %s1493_s28 = sand.u32 1, %s1384_s14  }
  0x15   : > { %s1114_s29 = smul.u32 320, %s1493_s28  ;;  %p1499_p0 = pnand %p1137_p13, %p1469_p4 }
  0x16   : > { %s1722_s27 = scalar_select %p1486_p11, 1, 0 }
  0x17   : > { %s1115_s30 = smul.u32 5120, %s1392_s16  ;;  %s164_s8 = scalar_lea.vmem [#allocation2], %s1114_s29 }
  0x18   : > { %s172_s9 = sshll.u32 %s164_s8, 4  ;;  %s161_s10 = scalar_lea.sflag [#allocation3], %s1493_s28  ;;  %s1508_s9 = int_to_ptr.vmem [resolvable:$true] %s172_s9 }
  0x19   : > { %s1506_s7 = scalar_lea.hbm %s1713_s0, %s1115_s30  ;;  %p1252_p3 = pneg %p1499_p0 }
  0x1a   : > { %s1250_s11 = scalar_lea.hbm %s1506_s7, 5120  ;;  %s1255_s21 = scalar_lea.hbm %s1713_s0, 10240 }
  0x1b   : > { %p1251_p2 = scmp.ne.s32.totalorder %s1506_s7, %s1250_s11  ;;  %p1256_p6 = scmp.lt.u32.totalorder %s1506_s7, %s1713_s0 }
  0x1c   : > { %p1257_p7 = scmp.lt.u32.totalorder %s1255_s21, %s1250_s11  ;;  %p1259_p13 = scmp.lt.u32.totalorder %s1250_s11, %s1506_s7 }
  0x1d   : > { %p1253_p4 = pnand %p1252_p3, %p1251_p2 }
  0x1e   : > { %p1258_p10 = por %p1257_p7, %p1256_p6 }
  0x1f   : > { %p1254_p5 = pneg %p1253_p4 }
  0x20   : > { %p1260_p12 = por %p1259_p13, %p1258_p10 }
  0x22   : > { %p1261_p1 = pnand %p1260_p12, %p1254_p5 }
  0x24   : > { %1264 = shalt.err (!%p1261_p1)
}
  0x25   : > { %s1265_s29 = scalar_lea.vmem %s1508_s9, 5120  ;;  %s1398_s30 = smov [#allocation2]  }
  0x26   : > { %p1266_p2 = scmp.ne.s32.totalorder %s1508_s9, %s1265_s29  ;;  %s1270_s5 = sshll.u32 %s1398_s30, 4  ;;  %s1271_s5 = int_to_ptr.vmem [resolvable:$false] %s1270_s5 }
  0x27   : > { %s1272_s6 = scalar_lea.vmem %s1271_s5, 10240  ;;  %p1273_p9 = scmp.lt.s32.totalorder %s1508_s9, %s1271_s5 }
  0x28   : > { %p1268_p4 = pnand %p1266_p2, %p1252_p3  ;;  %p1274_p6 = scmp.lt.s32.totalorder %s1272_s6, %s1265_s29 }
  0x2a   : > { %p1269_p11 = pneg %p1268_p4  ;;  %p1275_p7 = por %p1274_p6, %p1273_p9 }
  0x2c   : > { %p1276_p10 = pnand %p1275_p7, %p1269_p11 }
  0x2e   : > { %1279 = shalt.err (!%p1276_p10)
}
  0x2f   : > { %s1399_s8 = smov 64   ;;  %s1400_s11 = smov 4  }
  0x30   : > { %1129 = dma.hbm_to_vmem [thread:$0]  (!%p1499_p0), %s1506_s7, 5120, %s1508_s9, %s161_s10, %s1399_s8, %s1399_s8, %s1400_s11  }
  0x31   : > { %p209_p12 = scmp.lt.s32.totalorder %s1396_s17, 3  ;;  %s1116_s18 = smul.u32 80, %s1493_s28 }
  0x32   : > { %p1724_p9 = scmp.ge.s32.totalorder %s1396_s17, 1  ;;  %s1117_s21 = smul.u32 1280, %s1392_s16 }
  0x33   : > { %s186_s30 = scalar_lea.vmem [#allocation5], %s1116_s18  ;;  %s183_s7 = scalar_lea.sflag [#allocation6], %s1493_s28 }
  0x34   : > { %p1543_p11 = pnand %p1724_p9, %p209_p12  ;;  %s1551_s29 = scalar_lea.hbm %s1714_s1, %s1117_s21 }
  0x35   : > { %s193_s5 = sshll.u32 %s186_s30, 4  ;;  %s1280_s9 = scalar_lea.hbm %s1551_s29, 1280  ;;  %s1553_s5 = int_to_ptr.vmem [resolvable:$true] %s193_s5 }
  0x36   : > { %p1281_p1 = scmp.ne.s32.totalorder %s1551_s29, %s1280_s9  ;;  %s1285_s8 = scalar_lea.hbm %s1714_s1, 2560 }
  0x37   : > { %p1286_p2 = scmp.lt.u32.totalorder %s1551_s29, %s1714_s1  ;;  %p1287_p4 = scmp.lt.u32.totalorder %s1285_s8, %s1280_s9 }
  0x38   : > { %p1283_p5 = pnand %p1281_p1, %p1252_p3  ;;  %p1289_p7 = scmp.lt.u32.totalorder %s1280_s9, %s1551_s29 }
  0x39   : > { %p1288_p6 = por %p1287_p4, %p1286_p2 }
  0x3a   : > { %p1284_p13 = pneg %p1283_p5 }
  0x3b   : > { %p1290_p10 = por %p1289_p7, %p1288_p6 }
  0x3d   : > { %p1291_p12 = pnand %p1290_p10, %p1284_p13 }
  0x3f   : > { %1294 = shalt.err (!%p1291_p12)
}
  0x40   : > { %s1295_s18 = scalar_lea.vmem %s1553_s5, 1280  ;;  %s1401_s22 = smov [#allocation5]  }
  0x41   : > { %p1296_p9 = scmp.ne.s32.totalorder %s1553_s5, %s1295_s18  ;;  %s1300_s23 = sshll.u32 %s1401_s22, 4  ;;  %s1301_s23 = int_to_ptr.vmem [resolvable:$false] %s1300_s23 }
  0x42   : > { %s1302_s30 = scalar_lea.vmem %s1301_s23, 2560  ;;  %p1303_p8 = scmp.lt.s32.totalorder %s1553_s5, %s1301_s23 }
  0x43   : > { %p1298_p1 = pnand %p1296_p9, %p1252_p3  ;;  %p1304_p2 = scmp.lt.s32.totalorder %s1302_s30, %s1295_s18 }
  0x45   : > { %p1299_p5 = pneg %p1298_p1  ;;  %p1305_p4 = por %p1304_p2, %p1303_p8 }
  0x47   : > { %p1306_p6 = pnand %p1305_p4, %p1299_p5 }
  0x49   : > { %1309 = shalt.err (!%p1306_p6)
}
  0x4a   : > { %s1402_s9 = smov 320   ;;  %s1403_s10 = smov 20  }
  0x4b   : > { %1132 = dma.hbm_to_vmem [thread:$0]  (!%p1499_p0), %s1551_s29, 1280, %s1553_s5, %s183_s7, %s1402_s9, %s1402_s9, %s1403_s10  }
  0x4c   : > { %213 = sbr.rel (%p1543_p11) target bundleno = 386 (0x182), region = 32  ;;  %s1584_s6 = sand.u32 (!%p1543_p11), 1, %s1380_s13  }
  0x4d   : > { %s1118_s8 = smul.u32 (!%p1543_p11), 320, %s1584_s6  ;;  %s216_s11 = scalar_lea.sflag (!%p1543_p11), [#allocation3], %s1584_s6 }
  0x4e   : > { %p1726_p8 = scmp.ne.s32.totalorder (!%p1543_p11), %s1720_s24, 0 }
  0x4f   : > { %s1588_s21 = scalar_lea.vmem (!%p1543_p11), [#allocation2], %s1118_s8 }
  0x53   : > { %1363 = dma.done.wait (%p1726_p8), %s216_s11, 5120  }
  0x54   : > { %1365 = vsyncadd (%p1726_p8), %s216_s11, 4294962176  ;;  %s1119_s28 = smul.u32 80, %s1584_s6  ;;  %s225_s4 = scalar_lea.sflag [#allocation6], %s1584_s6 }
  0x56   : > { %s1596_s19 = scalar_lea.vmem [#allocation5], %s1119_s28 }
  0x57   : > { %1367 = dma.done.wait (%p1726_p8), %s225_s4, 1280  }
  0x58   : > { %1369 = vsyncadd (%p1726_p8), %s225_s4, 4294966016  ;;  %v1404_v0 = vmov 0   ;;  %v1196_v1 = vld [vmem:[%s1588_s21 + $0x40] sm:$0xff]   ;;  %v1200_v5 = vld [vmem:[%s1588_s21 + $0x48] sm:$0xff]   ;;  %p261_p0 = scmp.lt.s32.totalorder %s1388_s15, 1  ;;  %s968_s22 = sshll.u32 %s1584_s6, 5 }
  0x59   : > { %1194 = vset.pattern.permute.xlu0 %v1404_v0  ;;  %1195 = vset.pattern.permute.xlu1 %v1404_v0  ;;  %v1197_v2 = vld [vmem:[%s1588_s21] sm:$0xff]   ;;  %v1201_v6 = vld [vmem:[%s1588_s21 + $0x8] sm:$0xff]   ;;  %v1204_v9 = vld [vmem:[%s1588_s21 + $0x50] sm:$0xff]   ;;  %s260_s23 = scalar_lea.vmem [#allocation7], %s968_s22  ;;  %s1027_s9 = sshll.u32 %s1388_s15, 9 }
  0x5a   : > { %1028 = vmatprep.subr.bf16.mxu0 %v1196_v1  ;;  %v1198_v3 = vld [vmem:[%s1588_s21 + $0xc0] sm:$0xff]   ;;  %v1202_v7 = vld [vmem:[%s1588_s21 + $0xc8] sm:$0xff]   ;;  %v1205_v10 = vld [vmem:[%s1588_s21 + $0x10] sm:$0xff]   ;;  %s262_s24 = scalar_select %p261_p0, %s1388_s15, 1 }
  0x5b   : > { %1029 = vmatpush3.bf16.msra.mxu0 %v1197_v2  ;;  %v1199_v4 = vld [vmem:[%s1588_s21 + $0x80] sm:$0xff]   ;;  %1056 = vmatprep.subr.bf16.mxu1 %v1198_v3  ;;  %v1203_v8 = vld [vmem:[%s1588_s21 + $0x88] sm:$0xff]   ;;  %v1206_v11 = vld [vmem:[%s1588_s21 + $0xd0] sm:$0xff]   ;;  %s841_s30 = sshll.u32 %s260_s23, 4  ;;  %s1664_s11 = scalar_lea.hbm %s1716_s3, %s1027_s9  ;;  %s1659_s30 = int_to_ptr.vmem [resolvable:$true] %s841_s30 }
  0x5c   : > { %1057 = vmatpush3.bf16.msra.mxu1 %v1199_v4  ;;  %1030 = vmatprep.subr.bf16.mxu0 %v1200_v5  ;;  %v1207_v12 = vld [vmem:[%s1588_s21 + $0x90] sm:$0xff]   ;;  %v1208_v13 = vld [vmem:[%s1588_s21 + $0x58] sm:$0xff]   ;;  %v1212_v17 = vld [vmem:[%s1588_s21 + $0x60] sm:$0xff]   ;;  %s1026_s29 = sshll.u32 %s262_s24, 5  ;;  %s827_s15 = scalar_lea.sflag [#allocation4], %s1584_s6 }
  0x5d   : > { %1058 = vmatprep.subr.bf16.mxu1 %v1202_v7  ;;  %v1209_v14 = vld [vmem:[%s1588_s21 + $0x18] sm:$0xff]   ;;  %v1213_v18 = vld [vmem:[%s1588_s21 + $0x20] sm:$0xff]   ;;  %v1216_v21 = vld [vmem:[%s1588_s21 + $0x68] sm:$0xff]   ;;  %s265_s18 = scalar_lea.vmem %s1715_s2, %s1026_s29  ;;  %p1727_p11 = scmp.ne.s32.totalorder %s1721_s25, 0 }
  0x5e   : > { %v1210_v15 = vld [vmem:[%s1588_s21 + $0xd8] sm:$0xff]   ;;  %v1214_v19 = vld [vmem:[%s1588_s21 + $0xe0] sm:$0xff]   ;;  %v1217_v22 = vld [vmem:[%s1588_s21 + $0x28] sm:$0xff]   ;;  %s1405_s28 = smov [#allocation7]  }
  0x5f   : > { %1031 = vmatpush3.bf16.msra.mxu0 %v1201_v6  ;;  %v1211_v16 = vld [vmem:[%s1588_s21 + $0x98] sm:$0xff]   ;;  %v1215_v20 = vld [vmem:[%s1588_s21 + $0xa0] sm:$0xff]   ;;  %v1218_v23 = vld [vmem:[%s1588_s21 + $0xe8] sm:$0xff]   ;;  %s1314_s4 = sshll.u32 %s1405_s28, 4  ;;  %s1315_s4 = int_to_ptr.vmem [resolvable:$false] %s1314_s4 }
  0x60   : > { %1059 = vmatpush3.bf16.msra.mxu1 %v1203_v8  ;;  %1032 = vmatprep.subr.bf16.mxu0 %v1204_v9  ;;  %v1219_v24 = vld [vmem:[%s1588_s21 + $0xa8] sm:$0xff]   ;;  %v1220_v25 = vld [vmem:[%s1588_s21 + $0x70] sm:$0xff]   ;;  %v1224_v29 = vld [vmem:[%s1588_s21 + $0x78] sm:$0xff]   ;;  %p1317_p10 = scmp.lt.s32.totalorder %s1659_s30, %s1315_s4 }
  0x61   : > { %1060 = vmatprep.subr.bf16.mxu1 %v1206_v11  ;;  %v1221_v26 = vld [vmem:[%s1588_s21 + $0x30] sm:$0xff]   ;;  %v1225_v30 = vld [vmem:[%s1588_s21 + $0x38] sm:$0xff]   ;;  %v1231_v35 = vld [vmem:[%s1588_s21 + $0x100] sm:$0xff]  }
  0x62   : > { %v1222_v27 = vld [vmem:[%s1588_s21 + $0xf0] sm:$0xff]   ;;  %v1226_v31 = vld [vmem:[%s1588_s21 + $0xf8] sm:$0xff]   ;;  %v1235_v38 = vld [vmem:[%s1588_s21 + $0x108] sm:$0xff]  }
  0x63   : > { %1033 = vmatpush3.bf16.msra.mxu0 %v1205_v10  ;;  %v1223_v28 = vld [vmem:[%s1588_s21 + $0xb0] sm:$0xff]   ;;  %v1230_v34 = vld [vmem:[%s1588_s21 + $0xb8] sm:$0xff]   ;;  %v1238_v45 = vld [vmem:[%s1588_s21 + $0x120] sm:$0xff]  }
  0x64   : > { %1061 = vmatpush3.bf16.msra.mxu1 %v1207_v12  ;;  %1034 = vmatprep.subr.bf16.mxu0 %v1208_v13  ;;  %v1227_v32 = vld [vmem:[%s1596_s19] ss:$20 sps:$4 sm:$0xff]   ;;  %v1229_v33 = vld [vmem:[%s1596_s19 + $0x4] ss:$20 sps:$4 sm:$0xff]   ;;  %v1232_v36 = vld [vmem:[%s1596_s19 + $0x8] ss:$20 sps:$4 sm:$0xff]  }
  0x65   : > { %1062 = vmatprep.subr.bf16.mxu1 %v1210_v15  ;;  %707 = vmatprep.mubr.bf16.mxu0 %v1229_v33  ;;  %v1234_v37 = vld [vmem:[%s1596_s19 + $0xc] ss:$20 sps:$4 sm:$0xff]   ;;  %v1242_v42 = vld [vmem:[%s1596_s19 + $0x28] ss:$20 sps:$4 sm:$0xff]   ;;  %v1245_v44 = vld [vmem:[%s1596_s19 + $0x30] ss:$20 sps:$4 sm:$0xff]  }
  0x66   : > { %756 = vmatprep.mubr.bf16.mxu1 %v1234_v37  ;;  %v1236_v39 = vld [vmem:[%s1588_s21 + $0x110] sm:$0xff]   ;;  %v1237_v41 = vld [vmem:[%s1588_s21 + $0x118] sm:$0xff]   ;;  %v359_v47 = vld [vmem:[%s265_s18] sm:$0xff] }
  0x67   : > { %1035 = vmatpush3.bf16.msra.mxu0 %v1209_v14  ;;  %v1239_v40 = vld [vmem:[%s1596_s19 + $0x2c] ss:$20 sps:$4 sm:$0xff]   ;;  %v1243_v43 = vld [vmem:[%s1596_s19 + $0x34] ss:$20 sps:$4 sm:$0xff]   ;;  %v1248_v46 = vld [vmem:[%s1596_s19 + $0x10] ss:$20 sps:$4 sm:$0xff]   ;;  %365 = vperm.xlu0 %1194, %v359_v47  }
  0x68   : > { %1063 = vmatpush3.bf16.msra.mxu1 %v1211_v16  ;;  %1036 = vmatprep.subr.bf16.mxu0 %v1212_v17  ;;  %v361_v48 = vld [vmem:[%s265_s18 + $0x10] sm:$0xff]  ;;  %v360_v49 = vld [vmem:[%s265_s18 + $0x8] sm:$0xff]  ;;  %v362_v51 = vld [vmem:[%s265_s18 + $0x18] sm:$0xff] }
  0x69   : > { %1064 = vmatprep.subr.bf16.mxu1 %v1214_v19  ;;  %375 = vperm.xlu1 %1195, %v361_v48   ;;  %v1241_v50 = vld [vmem:[%s1588_s21 + $0x128] sm:$0xff]   ;;  %v1246_v52 = vld [vmem:[%s1588_s21 + $0x130] sm:$0xff]   ;;  %v1247_v53 = vld [vmem:[%s1588_s21 + $0x138] sm:$0xff]   ;;  %s1310_s21 = scalar_lea.vmem %s1659_s30, 512 }
  0x6a   : > { %v1249_v54 = vld [vmem:[%s1596_s19 + $0x38] ss:$20 sps:$4 sm:$0xff]   ;;  %p1311_p3 = scmp.ne.s32.totalorder %s1659_s30, %s1310_s21  ;;  %s1316_s19 = scalar_lea.vmem %s1315_s4, 1024 }
  0x6b   : > { %1037 = vmatpush3.bf16.msra.mxu0 %v1213_v18  ;;  %370 = vperm.xlu0 %1194, %v360_v49   ;;  %p1318_p12 = scmp.lt.s32.totalorder %s1316_s19, %s1310_s21 }
  0x6c   : > { %1065 = vmatpush3.bf16.msra.mxu1 %v1215_v20  ;;  %1038 = vmatprep.subr.bf16.mxu0 %v1216_v21  ;;  %p1312_p13 = pnand %p1311_p3, %p1727_p11 }
  0x6d   : > { %1066 = vmatprep.subr.bf16.mxu1 %v1218_v23  ;;  %380 = vperm.xlu1 %1195, %v362_v51   ;;  %p1319_p9 = por %p1318_p12, %p1317_p10 }
  0x6e   : > { %p1313_p7 = pneg %p1312_p13 }
  0x6f   : > { %1039 = vmatpush3.bf16.msra.mxu0 %v1217_v22 }
  0x70   : > { %1067 = vmatpush3.bf16.msra.mxu1 %v1219_v24  ;;  %1040 = vmatprep.subr.bf16.mxu0 %v1220_v25  ;;  %p1320_p1 = pnand %p1319_p9, %p1313_p7 }
  0x71   : > { %1068 = vmatprep.subr.bf16.mxu1 %v1222_v27 }
  0x73   : > { %1041 = vmatpush3.bf16.msra.mxu0 %v1221_v26 }
  0x74   : > { %1069 = vmatpush3.bf16.msra.mxu1 %v1223_v28  ;;  %1042 = vmatprep.subr.bf16.mxu0 %v1224_v29 }
  0x75   : > { %1070 = vmatprep.subr.bf16.mxu1 %v1226_v31 }
  0x77   : > { %1043 = vmatpush3.bf16.msra.mxu0 %v1225_v30 }
  0x78   : > { %1071 = vmatpush3.bf16.msra.mxu1 %v1230_v34  ;;  %1094 = vmatprep.subr.bf16.mxu0 %v1231_v35 }
  0x7a   : > { %708 = vmatmul.mubr.bf16.vlgmr.msra.gmra.mrb[0].mxu0 %v1227_v32 }
  0x7b   : > { %1095 = vmatpush3.bf16.msra.mxu0 %v1231_v35  ;;  %757 = vmatmul.mubr.bf16.vlgmr.msra.gmra.mrb[0].mxu1 %v1232_v36 }
  0x7c   : > { %1096 = vmatprep.subr.bf16.mxu0 %v1235_v38  ;;  %715 = vmatprep.mubr.bf16.mxu0 %v1239_v40 }
  0x7d   : > { %764 = vmatprep.mubr.bf16.mxu1 %v1243_v43 }
  0x7f   : > { %1097 = vmatpush3.bf16.msra.mxu0 %v1235_v38 }
  0x80   : > { %1098 = vmatprep.subr.bf16.mxu0 %v1236_v39 }
  0x82   : > { %716 = vmatmul.mubr.bf16.gmra.mrb[4].mxu0 %v1242_v42 }
  0x83   : > { %1099 = vmatpush3.bf16.msra.mxu0 %v1236_v39  ;;  %765 = vmatmul.mubr.bf16.gmra.mrb[4].mxu1 %v1245_v44 }
  0x84   : > { %1100 = vmatprep.subr.bf16.mxu0 %v1237_v41  ;;  %1110 = vmatprep.mubr.bf16.mxu0 %v1248_v46 }
  0x87   : > { %1101 = vmatpush3.bf16.msra.mxu0 %v1237_v41 }
  0x88   : > { %1102 = vmatprep.subr.bf16.mxu0 %v1238_v45 }
  0x8b   : > { %1103 = vmatpush3.bf16.msra.mxu0 %v1238_v45 }
  0x8c   : > { %1104 = vmatprep.subr.bf16.mxu0 %v1241_v50 }
  0x8f   : > { %1105 = vmatpush3.bf16.msra.mxu0 %v1241_v50 }
  0x90   : > { %1106 = vmatprep.subr.bf16.mxu0 %v1246_v52 }
  0x93   : > { %1107 = vmatpush3.bf16.msra.mxu0 %v1246_v52 }
  0x94   : > { %1108 = vmatprep.subr.bf16.mxu0 %v1247_v53 }
  0x97   : > { %1109 = vmatpush3.bf16.msra.mxu0 %v1247_v53 }
  0x9a   : > { %1111 = vmatmul.mubr.bf16.vlgmr.msra.gmra.mrb[8].mxu0 %v1249_v54 }
  0xe6   : > { %v366_v55 = vpop.permute.xlu0 %365 }
  0xe8   : > { %v376_v2 = vpop.permute.xlu1 %375 }
  0xea   : > { %v371_v60 = vpop.permute.xlu0 %370 }
  0xec   : > { %v381_v14 = vpop.permute.xlu1 %380 }
 0x14d   : > { %v1044_v56 = vpop.f32.mrb[0].mxu0 }
 0x14e   : > { %v1045_v57 = vpop.f32.mrb[1].mxu0  ;;  %v1072_v61 = vpop.f32.mrb[0].mxu1 }
 0x14f   : > { %v1046_v58 = vadd.f32 %v1045_v57, %v1044_v56  ;;  %v1047_v59 = vpop.f32.mrb[2].mxu0  ;;  %v1073_v1 = vpop.f32.mrb[1].mxu1 }
 0x150   : > { %v1048_v62 = vpop.f32.mrb[3].mxu0  ;;  %v1074_v3 = vadd.f32 %v1073_v1, %v1072_v61  ;;  %v1075_v4 = vpop.f32.mrb[2].mxu1 }
 0x151   : > { %v710_v63 = vadd.f32 %v1046_v58, %v366_v55  ;;  %v1049_v0 = vadd.f32 %v1048_v62, %v1047_v59  ;;  %v1076_v6 = vpop.f32.mrb[3].mxu1 }
 0x152   : > { %v1077_v7 = vadd.f32 %v1076_v6, %v1075_v4 }
 0x153   : > { %v713_v5 = vadd.f32 %v1049_v0, %v371_v60  ;;  %v759_v8 = vadd.f32 %v1074_v3, %v710_v63 }
 0x155   : > { %v1050_v9 = vpop.f32.mrb[4].mxu0  ;;  %v762_v11 = vadd.f32 %v1077_v7, %v713_v5 }
 0x156   : > { %v1051_v10 = vpop.f32.mrb[5].mxu0  ;;  %v1078_v15 = vpop.f32.mrb[4].mxu1 }
 0x157   : > { %v1052_v12 = vadd.f32 %v1051_v10, %v1050_v9  ;;  %v1053_v13 = vpop.f32.mrb[6].mxu0  ;;  %v1079_v19 = vpop.f32.mrb[5].mxu1 }
 0x158   : > { %v1054_v16 = vpop.f32.mrb[7].mxu0  ;;  %v1080_v20 = vadd.f32 %v1079_v19, %v1078_v15  ;;  %v1081_v21 = vpop.f32.mrb[6].mxu1 }
 0x159   : > { %v718_v17 = vadd.f32 %v1052_v12, %v376_v2  ;;  %v1055_v18 = vadd.f32 %v1054_v16, %v1053_v13  ;;  %v1082_v23 = vpop.f32.mrb[7].mxu1 }
 0x15a   : > { %v1083_v24 = vadd.f32 %v1082_v23, %v1081_v21 }
 0x15b   : > { %v721_v22 = vadd.f32 %v1055_v18, %v381_v14  ;;  %v767_v25 = vadd.f32 %v1080_v20, %v718_v17 }
 0x15d   : > { %v770_v26 = vadd.f32 %v1083_v24, %v721_v22 }
 0x16d   : > { %v1112_v27 = vpop.f32.mrb[8].mxu0 }
 0x16e   : > { %v816_v28 = vadd.f32 %v1112_v27, %v767_v25  ;;  %v807_v29 = vpop.f32.mrb[9].mxu0 }
 0x16f   : > { %v808_v30 = vadd.f32 %v807_v29, %v759_v8  ;;  %v1113_v31 = vpop.f32.mrb[10].mxu0 }
 0x170   : > { %824 = vst [vmem:[%s260_s23 + $0x10] sm:$0xff] %v816_v28  ;;  %v819_v32 = vadd.f32 %v1113_v31, %v770_v26  ;;  %v810_v33 = vpop.f32.mrb[11].mxu0 }
 0x171   : > { %822 = vst [vmem:[%s260_s23] sm:$0xff] %v808_v30  ;;  %v811_v34 = vadd.f32 %v810_v33, %v762_v11 }
 0x172   : > { %825 = vst [vmem:[%s260_s23 + $0x18] sm:$0xff] %v819_v32 }
 0x173   : > { %823 = vst [vmem:[%s260_s23 + $0x8] sm:$0xff] %v811_v34 }
 0x174   : > { %1323 = shalt.err (!%p1320_p1)
}
 0x175   : > { %s1324_s24 = scalar_lea.hbm %s1664_s11, 512  ;;  %s1328_s7 = scalar_lea.hbm %s1716_s3, 1024 }
 0x176   : > { %p1325_p5 = scmp.ne.s32.totalorder %s1664_s11, %s1324_s24  ;;  %p1329_p6 = scmp.lt.u32.totalorder %s1664_s11, %s1716_s3 }
 0x177   : > { %p1330_p8 = scmp.lt.u32.totalorder %s1328_s7, %s1324_s24  ;;  %p1332_p3 = scmp.lt.u32.totalorder %s1324_s24, %s1664_s11 }
 0x178   : > { %p1326_p2 = pnand %p1325_p5, %p1727_p11 }
 0x179   : > { %p1331_p0 = por %p1330_p8, %p1329_p6 }
 0x17a   : > { %p1327_p4 = pneg %p1326_p2 }
 0x17b   : > { %p1333_p13 = por %p1332_p3, %p1331_p0 }
 0x17d   : > { %p1334_p7 = pnand %p1333_p13, %p1327_p4 }
 0x17f   : > { %1337 = shalt.err (!%p1334_p7)
}
 0x180   : > { %s1406_s23 = smov 128   ;;  %s1407_s9 = smov 8  }
 0x181   : > { %1124 = dma.vmem_to_hbm [thread:$0]  (%p1727_p11), %s1659_s30, 512, %s1664_s11, %s827_s15, %s1406_s23, %s1406_s23, %s1407_s9  }
 0x182 PF: > { %s856_s10 = sand.u32 1, %s1376_s12   ;;  %p1728_p10 = scmp.ne.s32.totalorder %s1722_s27, 0 }
 0x183   : > { %p1729_p12 = scmp.ge.s32.totalorder %s1396_s17, 2  ;;  %s857_s8 = scalar_lea.sflag [#allocation4], %s856_s10 }
 0x185   : > { %p1134_p9 = pnand %p1729_p12, %p1728_p10 }
 0x187   : > { %1371 = dma.done.wait (!%p1134_p9), %s857_s8, 512  }
 0x188   : > { %1373 = vsyncadd (!%p1134_p9), %s857_s8, 4294966784  ;;  %s22_s17 = sadd.s32 1, %s1396_s17   ;;  %s1730_s12 = smov %s1380_s13 }
 0x189   : > { %p19_p1 = scmp.ge.s32.totalorder %s22_s17, 4   ;;  %s1731_s13 = smov %s1384_s14 }
 0x18a   : > { %s1732_s14 = smov %s1484_s26  ;;  %s1733_s15 = smov %s1392_s16 }
 0x18b   : > { %s1734_s16 = smov %s1736_s20  ;;  %21 = sbr.rel (!%p19_p1) target bundleno = 8 (0x8), region = 93 }
 0x192   :  { %862 = vsyncpa [#allocation3], 1 }
 0x193   :  { %864 = vsyncpa [#allocation3 + $0x1], 1 }
 0x194   :  { %865 = vsyncpa [#allocation6], 1 }
 0x195   :  { %867 = vsyncpa [#allocation6 + $0x1], 1 }
 0x196   :  { %868 = vsyncpa [#allocation4], 1 }
 0x197   :  { %870 = vsyncpa [#allocation4 + $0x1], 1 }

</bundles_post_ra>
